<compile_context>
chip_gen: v7x
topology: tpu7x:2x2x1
jax: 0.10.0
libtpu: 0.0.40
codegen_flags: <defaults>
</compile_context>

<pallas_src>
import functools

import jax
import jax.numpy as jnp
from jax.experimental import pallas as pl
from jax.experimental.pallas import tpu as pltpu


def _box_regression_kernel(row_tab_ref, grid_tab_ref, x_ref, out_ref, *,
                           approx_recip):
    """Decode a (Bb, A*5, G*G) slab of raw predictions.

    row_tab_ref:  VMEM (1, A*5, 5) f32, per-row constants
                  [mul, is_cx, is_cy, is_sig, sign].
    grid_tab_ref: VMEM (1, 2, G*G) f32 cell grid [gx; gy] (flat, row-major).
    x_ref:        VMEM (Bb, A*5, G*G) raw network output (any float dtype);
                  row r holds anchor r//5, channel r%5 = [tx,ty,tw,th,tconf].
    out_ref:      VMEM (Bb, A*5, G*G) decoded [bx*s, by*s, bw*s, bh*s, conf].
    """
    p = x_ref[...].astype(jnp.float32)                  # one whole-tile load

    tab = row_tab_ref[...]                              # (1, rows, 5)
    mul = tab[:, :, 0:1]                                # stride / a_w / a_h / 1
    is_cx = tab[:, :, 1:2]
    is_cy = tab[:, :, 2:3]
    sig = tab[:, :, 3:4] > 0.5                          # sigmoid rows (cx,cy,conf)
    sgn = tab[:, :, 4:5]                                # -1 on sigmoid rows, +1 else

    gtab = grid_tab_ref[...]                            # (1, 2, GG)
    gx = gtab[:, 0:1, :]                                # (1, 1, GG)
    gy = gtab[:, 1:2, :]

    # One EUP exp pass: exp(-p) on sigmoid rows, exp(p) on w/h rows.
    e = jnp.exp(p * sgn)
    # sigmoid(p) = 1 / (1 + exp(-p)); keep a *select* (not a blend) so that an
    # overflowed exp on the discarded branch can never produce NaN.
    t = jnp.where(sig, pl.reciprocal(1.0 + e, approx=approx_recip), e)

    # additive term: gx on cx rows, gy on cy rows, 0 elsewhere.  Built at
    # (1, rows, GG) so it amortizes over the Bb batches in the block.
    add = is_cx * gx + is_cy * gy

    out_ref[...] = ((t + add) * mul).astype(out_ref.dtype)   # lane-dense store


def _build_row_table(anchors_px, stride):
    """(1, A*5, 5) f32: [mul, is_cx, is_cy, is_sig, sign] per row."""
    A = anchors_px.shape[0]
    rows = A * 5
    c = jnp.arange(rows) % 5
    is_cx = (c == 0).astype(jnp.float32)
    is_cy = (c == 1).astype(jnp.float32)
    is_sig = ((c == 0) | (c == 1) | (c == 4)).astype(jnp.float32)
    sgn = 1.0 - 2.0 * is_sig
    aw = jnp.repeat(anchors_px[:, 0], 5)                # anchors already in pixels
    ah = jnp.repeat(anchors_px[:, 1], 5)                # (== scaled_anchor * stride)
    mul = jnp.where(c == 4, 1.0, jnp.float32(stride))
    mul = jnp.where(c == 2, aw, mul)
    mul = jnp.where(c == 3, ah, mul)
    tab = jnp.stack([mul, is_cx, is_cy, is_sig, sgn], axis=-1).astype(jnp.float32)
    return tab.reshape(1, rows, 5)


def _build_grid_table(G):
    """(1, 2, G*G) f32 cell grid: flat index = gy*G + gx (row-major)."""
    col = jnp.arange(G * G)
    gx = (col % G).astype(jnp.float32)
    gy = (col // G).astype(jnp.float32)
    return jnp.stack([gx, gy], axis=0).reshape(1, 2, G * G)


def _pick_batches_per_block(B, rows, GG, in_itemsize, out_itemsize,
                            budget_bytes):
    """Largest batch chunk whose double-buffered in+out blocks fit the budget,
    keeping >= 2 grid steps when B >= 2 (v7x has 2 TensorCores)."""
    rows_pad = ((rows + 7) // 8) * 8
    gg_pad = ((GG + 127) // 128) * 128
    slab = rows_pad * gg_pad * (in_itemsize + out_itemsize) * 2   # 2x: double buffer
    bb = max(1, min(B, int(budget_bytes // slab)))
    if B >= 2:
        bb = max(1, min(bb, B // 2))
    while B % bb:                                       # avoid ragged edge blocks
        bb -= 1
    return bb, slab


def box_regression_forward(x, anchors, image_size, targets=None, *,
                           out_dtype=jnp.float32, approx_recip=True,
                           layout="torch", vmem_block_budget_bytes=8 << 20):
    """x: (B, A*5, G, G) NCHW; anchors: (A, 2) float32 in image pixels.

    layout="torch"       -> (B, A*G*G, 5) like the PyTorch module (extra
                            graph-level transpose of the whole output).
    layout="lane_dense"  -> (B, A*5, G*G) kernel-native layout (cheaper; use
                            when the consumer can accept it).
    """
    B, C, G, G2 = x.shape
    anchors = jnp.asarray(anchors, dtype=jnp.float32)
    A = anchors.shape[0]
    assert C == A * 5 and G == G2, "channel dim must be num_anchors * 5"
    GG = G * G
    rows = A * 5
    stride = float(image_size) / float(G)

    # (B, A*5, G, G) -> (B, A*5, G*G): channels on sublanes, spatial on lanes.
    x_flat = x.reshape(B, rows, GG)
    row_tab = _build_row_table(anchors, stride)
    grid_tab = _build_grid_table(G)

    out_dtype = jnp.dtype(out_dtype)
    bb, slab_bytes = _pick_batches_per_block(
        B, rows, GG, x_flat.dtype.itemsize, out_dtype.itemsize,
        vmem_block_budget_bytes)
    grid = (B // bb,)

    # Only raise the scoped-VMEM limit when the block actually needs it
    # (v5e default is 16 MiB; v6e/v7x default 32 MiB; v7x physical is 64 MiB).
    vmem_need = bb * slab_bytes + (rows * 5 + 2 * GG) * 4 * 2
    cparams = dict(dimension_semantics=("parallel",))
    if vmem_need > 12 * (1 << 20):
        cparams["vmem_limit_bytes"] = int(min(32 << 20, 2 * vmem_need))

    n_elem = B * rows * GG
    cost = pl.CostEstimate(
        flops=8 * n_elem,
        transcendentals=2 * n_elem,
        bytes_accessed=n_elem * (x_flat.dtype.itemsize + out_dtype.itemsize)
        + (rows * 5 + 2 * GG) * 4,
    )

    kernel = functools.partial(_box_regression_kernel, approx_recip=approx_recip)
    out_k = pl.pallas_call(
        kernel,
        out_shape=jax.ShapeDtypeStruct((B, rows, GG), out_dtype),
        grid=grid,
        in_specs=[
            pl.BlockSpec((1, rows, 5), lambda b: (0, 0, 0)),     # row constants
            pl.BlockSpec((1, 2, GG), lambda b: (0, 0, 0)),       # cell grid
            pl.BlockSpec((bb, rows, GG), lambda b: (b, 0, 0)),   # predictions
        ],
        out_specs=pl.BlockSpec((bb, rows, GG), lambda b: (b, 0, 0)),
        compiler_params=pltpu.CompilerParams(**cparams),
        cost_estimate=cost,
    )(row_tab, grid_tab, x_flat)

    if layout == "lane_dense":
        output = out_k                                   # (B, A*5, GG)
    else:
        # (B, A*5, GG) -> (B, A*GG, 5) to match torch.cat([boxes*stride, conf], -1).
        # Done at the graph level (in out_dtype) so the kernel store stays
        # lane-dense; consumers that accept lane_dense should skip this pass.
        output = jnp.transpose(out_k.reshape(B, A, 5, GG),
                               (0, 1, 3, 2)).reshape(B, A * GG, 5)

    if targets is None:
        return output, 0.0
    # TODO(synk): training path (fn.build_targets + MSE/BCE losses + metrics) relies on
    # an external helper not provided in the module; only the inference decode is implemented.
    raise NotImplementedError("targets path not implemented")


def _reference_forward(x, anchors, image_size):
    """Pure-JAX reproduction of the PyTorch forward (targets=None) for checking."""
    B, C, G, _ = x.shape
    A = anchors.shape[0]
    pred = x.astype(jnp.float32).reshape(B, A, 5, G, G).transpose(0, 1, 3, 4, 2)
    cx = jax.nn.sigmoid(pred[..., 0])
    cy = jax.nn.sigmoid(pred[..., 1])
    w = pred[..., 2]
    h = pred[..., 3]
    conf = jax.nn.sigmoid(pred[..., 4])
    stride = image_size / G
    grid_x = jnp.tile(jnp.arange(G, dtype=jnp.float32), (G, 1)).reshape(1, 1, G, G)
    grid_y = jnp.tile(jnp.arange(G, dtype=jnp.float32), (G, 1)).T.reshape(1, 1, G, G)
    sa = anchors / stride
    aw = sa[:, 0].reshape(1, A, 1, 1)
    ah = sa[:, 1].reshape(1, A, 1, 1)
    bx = grid_x + cx
    by = grid_y + cy
    bw = jnp.exp(w) * aw
    bh = jnp.exp(h) * ah
    boxes = jnp.stack([bx, by, bw, bh], axis=-1).reshape(B, -1, 4) * stride
    return jnp.concatenate([boxes, conf.reshape(B, -1, 1)], axis=-1)


if __name__ == "__main__":
    key = jax.random.PRNGKey(0)

    # Deterministic config (the module's "parameters"): 3 anchors, image_size=64.
    anchors = jnp.array([[10.0, 13.0], [16.0, 30.0], [33.0, 23.0]], dtype=jnp.float32)
    image_size = 64
    B, A, G = 2, anchors.shape[0], 16

    x = jax.random.normal(key, (B, A * 5, G, G), dtype=jnp.float32)
    ref = _reference_forward(x, anchors, image_size)

    # Exact-divide path: must match the PyTorch math tightly.
    out_exact, loss = box_regression_forward(x, anchors, image_size, targets=None,
                                             approx_recip=False)
    out_exact = jax.block_until_ready(out_exact)
    assert out_exact.shape == (B, A * G * G, 5)
    assert loss == 0.0
    assert jnp.allclose(out_exact, ref, atol=1e-4, rtol=1e-5), "exact path mismatch"

    # Default fast path (EUP approx reciprocal for the sigmoid denominator):
    # sub-pixel decode error, checked at a correspondingly loose tolerance.
    out_fast, _ = box_regression_forward(x, anchors, image_size, targets=None)
    out_fast = jax.block_until_ready(out_fast)
    assert out_fast.shape == (B, A * G * G, 5)
    assert jnp.allclose(out_fast, ref, atol=3e-2, rtol=1e-2), "approx path mismatch"

    print("KERNEL_OK")
</pallas_src>

<mosaic_0001>
module attributes {stable_mosaic.version = 11 : i64} {
  func.func @_box_regression_kernel(%arg0: i32, %arg1: memref<1x15x5xf32, #tpu.memory_space<vmem>>, %arg2: memref<1x2x256xf32, #tpu.memory_space<vmem>>, %arg3: memref<1x15x256xf32, #tpu.memory_space<vmem>>, %arg4: memref<1x15x256xf32, #tpu.memory_space<vmem>>) attributes {dimension_semantics = [#tpu.dimension_semantics<parallel>], iteration_bounds = array<i64: 2>, scalar_prefetch = 0 : i64, scratch_operands = 0 : i64, tpu.core_type = #tpu.core_type<tc>, window_params = [{pipeline_mode = #tpu.pipeline_mode<synchronous>, transform_indices = @transform_0, window_bounds = array<i64: 1, 15, 5>}, {pipeline_mode = #tpu.pipeline_mode<synchronous>, transform_indices = @transform_1, window_bounds = array<i64: 1, 2, 256>}, {transform_indices = @transform_2, window_bounds = array<i64: 1, 15, 256>}, {transform_indices = @transform_3, window_bounds = array<i64: 1, 15, 256>}]} {
    %c0 = arith.constant 0 : index
    %c0_0 = arith.constant 0 : index
    %c0_1 = arith.constant 0 : index
    %0 = vector.load %arg3[%c0, %c0_0, %c0_1] : memref<1x15x256xf32, #tpu.memory_space<vmem>>, vector<1x15x256xf32>
    %c0_2 = arith.constant 0 : index
    %c0_3 = arith.constant 0 : index
    %c0_4 = arith.constant 0 : index
    %1 = vector.load %arg1[%c0_2, %c0_3, %c0_4] : memref<1x15x5xf32, #tpu.memory_space<vmem>>, vector<1x15x5xf32>
    %2 = vector.extract_strided_slice %1 {offsets = [0, 0, 0], sizes = [1, 15, 1], strides = [1, 1, 1]} : vector<1x15x5xf32> to vector<1x15x1xf32>
    %3 = vector.extract_strided_slice %1 {offsets = [0, 0, 1], sizes = [1, 15, 1], strides = [1, 1, 1]} : vector<1x15x5xf32> to vector<1x15x1xf32>
    %4 = vector.extract_strided_slice %1 {offsets = [0, 0, 2], sizes = [1, 15, 1], strides = [1, 1, 1]} : vector<1x15x5xf32> to vector<1x15x1xf32>
    %5 = vector.extract_strided_slice %1 {offsets = [0, 0, 3], sizes = [1, 15, 1], strides = [1, 1, 1]} : vector<1x15x5xf32> to vector<1x15x1xf32>
    %cst = arith.constant 5.000000e-01 : f32
    %6 = vector.broadcast %cst : f32 to vector<1x15x1xf32>
    %7 = arith.cmpf ogt, %5, %6 : vector<1x15x1xf32>
    %8 = vector.extract_strided_slice %1 {offsets = [0, 0, 4], sizes = [1, 15, 1], strides = [1, 1, 1]} : vector<1x15x5xf32> to vector<1x15x1xf32>
    %c0_5 = arith.constant 0 : index
    %c0_6 = arith.constant 0 : index
    %c0_7 = arith.constant 0 : index
    %9 = vector.load %arg2[%c0_5, %c0_6, %c0_7] : memref<1x2x256xf32, #tpu.memory_space<vmem>>, vector<1x2x256xf32>
    %10 = vector.extract_strided_slice %9 {offsets = [0, 0, 0], sizes = [1, 1, 256], strides = [1, 1, 1]} : vector<1x2x256xf32> to vector<1x1x256xf32>
    %11 = vector.extract_strided_slice %9 {offsets = [0, 1, 0], sizes = [1, 1, 256], strides = [1, 1, 1]} : vector<1x2x256xf32> to vector<1x1x256xf32>
    %12 = vector.broadcast %8 : vector<1x15x1xf32> to vector<1x15x256xf32>
    %13 = arith.mulf %0, %12 : vector<1x15x256xf32>
    %14 = math.exp %13 : vector<1x15x256xf32>
    %cst_8 = arith.constant 1.000000e+00 : f32
    %15 = vector.broadcast %cst_8 : f32 to vector<1x15x256xf32>
    %16 = arith.addf %15, %14 : vector<1x15x256xf32>
    %17 = tpu.reciprocal %16 : vector<1x15x256xf32> -> vector<1x15x256xf32>
    %18 = vector.shape_cast %7 : vector<1x15x1xi1> to vector<1x15x1xi1>
    %19 = vector.broadcast %18 : vector<1x15x1xi1> to vector<1x15x256xi1>
    %20 = arith.select %19, %17, %14 : vector<1x15x256xi1>, vector<1x15x256xf32>
    %21 = vector.broadcast %3 : vector<1x15x1xf32> to vector<1x15x256xf32>
    %22 = vector.broadcast %10 : vector<1x1x256xf32> to vector<1x15x256xf32>
    %23 = arith.mulf %21, %22 : vector<1x15x256xf32>
    %24 = vector.broadcast %4 : vector<1x15x1xf32> to vector<1x15x256xf32>
    %25 = vector.broadcast %11 : vector<1x1x256xf32> to vector<1x15x256xf32>
    %26 = arith.mulf %24, %25 : vector<1x15x256xf32>
    %27 = arith.addf %23, %26 : vector<1x15x256xf32>
    %28 = arith.addf %20, %27 : vector<1x15x256xf32>
    %29 = vector.broadcast %2 : vector<1x15x1xf32> to vector<1x15x256xf32>
    %30 = arith.mulf %28, %29 : vector<1x15x256xf32>
    %c0_9 = arith.constant 0 : index
    %c0_10 = arith.constant 0 : index
    %c0_11 = arith.constant 0 : index
    %31 = vector.load %arg4[%c0_9, %c0_10, %c0_11] : memref<1x15x256xf32, #tpu.memory_space<vmem>>, vector<1x15x256xf32>
    tpu.vector_store %arg4[%c0_9, %c0_10, %c0_11], %30 {strides = array<i32>} : memref<1x15x256xf32, #tpu.memory_space<vmem>>, vector<1x15x256xf32>,
    return
  }
  func.func @transform_0(%arg0: i32) -> (i32, i32, i32) {
    %c0_i32 = arith.constant 0 : i32
    %c0_i32_0 = arith.constant 0 : i32
    %c0_i32_1 = arith.constant 0 : i32
    %c0_i32_2 = arith.constant 0 : i32
    return %c0_i32, %c0_i32_0, %c0_i32_1 : i32, i32, i32
  }
  func.func @transform_1(%arg0: i32) -> (i32, i32, i32) {
    %c0_i32 = arith.constant 0 : i32
    %c0_i32_0 = arith.constant 0 : i32
    %c0_i32_1 = arith.constant 0 : i32
    %c0_i32_2 = arith.constant 0 : i32
    return %c0_i32, %c0_i32_0, %c0_i32_1 : i32, i32, i32
  }
  func.func @transform_2(%arg0: i32) -> (i32, i32, i32) {
    %c0_i32 = arith.constant 0 : i32
    %c0_i32_0 = arith.constant 0 : i32
    %c0_i32_1 = arith.constant 0 : i32
    return %arg0, %c0_i32, %c0_i32_0 : i32, i32, i32
  }
  func.func @transform_3(%arg0: i32) -> (i32, i32, i32) {
    %c0_i32 = arith.constant 0 : i32
    %c0_i32_0 = arith.constant 0 : i32
    %c0_i32_1 = arith.constant 0 : i32
    return %arg0, %c0_i32, %c0_i32_0 : i32, i32, i32
  }
}

</mosaic_0001>

<bundles_post_ra>
// kernel: tpu_custom_call.1
= control target key start
LH: loop header
LB: loop body
LE: loop exit
PB: predicated region body
PF: predicated region fallthrough
CT: control target
= control target key end

     0   :  { %s447_s12 = smov 0   ;;  %s484_s0 = inlined_call_operand.vmem [shape: f32[1,15,5], index: 0, kind: input, shape index: {}]   ;;  %s485_s1 = inlined_call_operand.vmem [shape: f32[1,2,256], index: 1, kind: input, shape index: {}]   ;;  %s486_s2 = inlined_call_operand.vmem [shape: f32[2,15,256], index: 2, kind: input, shape index: {}]   ;;  %s487_s3 = inlined_call_operand.vmem [shape: f32[2,15,256], index: 3, kind: output, shape index: {}]  }
   0x1 LB: > { %s364_s13 = sadd.s32 4294967295, %s420_s12   ;;  %p368_p0 = scmp.ge.s32.totalorder %s420_s12, 1  ;;  %s420_s12 = sphi %s447_s12, %s13_s12  }
   0x2   : > { %p137_p1 = scmp.lt.s32.totalorder %s420_s12, 3 }
   0x4   : > { %p138_p2 = pnand %p368_p0, %p137_p1 }
   0x5   : > { %v175_v0 = vld [vmem:[%s484_s0] sm:$0xff] (!%p138_p2)  ;;  %v422_v1 = vmov (!%p138_p2), 4   ;;  %v423_v2 = vmov (!%p138_p2), 1   ;;  %v176_v3 = vld [vmem:[%s484_s0 + $0x8] sm:$0x7f] (!%p138_p2)  ;;  %v424_v4 = vmov (!%p138_p2), 2   ;;  %v233_v18 = vlaneseq (!%p138_p2) }
   0x6   : > { %141 = sbr.rel (%p138_p2) target bundleno = 174 (0xae), region = 32  ;;  %390 = vset.pattern.permute.xlu0 (!%p138_p2), %v422_v1  ;;  %391 = vset.pattern.permute.xlu1 (!%p138_p2), %v423_v2  ;;  %vm177_vm0 = vcmp.gt.f32.partialorder (!%p138_p2), %v175_v0, 0.5  ;;  %vm178_vm1 = vcmp.gt.f32.partialorder (!%p138_p2), %v176_v3, 0.5  ;;  %v425_v5 = vmov (!%p138_p2), 0   ;;  %v426_v8 = vmov (!%p138_p2), 3   ;;  %p161_p3 = scmp.lt.s32.totalorder (!%p138_p2), %s364_s13, 1 }
   0x7   : > { %182 = vperm.xlu0 (!%p138_p2), %390, %v175_v0   ;;  %225 = vperm.xlu1 (!%p138_p2), %391, %v175_v0   ;;  %v210_v6 = vsel (!%p138_p2), %vm177_vm0, 1, %v425_v5  ;;  %v211_v7 = vsel (!%p138_p2), %vm178_vm1, 1, %v425_v5  ;;  %v234_v25 = vshrl.u32 (!%p138_p2), %v233_v18, 7  ;;  %v179_v28 = vld [vmem:[%s485_s1] sm:$0xf] (!%p138_p2) }
   0x9   : > { %v235_v26 = vsub.s32 (!%p138_p2), 0, %v234_v25  ;;  %v265_v27 = vsub.s32 (!%p138_p2), 1, %v234_v25  ;;  %v239_v29 = vsub.s32 (!%p138_p2), 2, %v234_v25  ;;  %v269_v31 = vsub.s32 (!%p138_p2), 3, %v234_v25 }
   0xb   : > { %187 = vperm.xlu0 (!%p138_p2), %390, %v176_v3   ;;  %229 = vperm.xlu1 (!%p138_p2), %391, %v176_v3   ;;  %v236_v35 = vrot.slane (!%p138_p2), %v179_v28, %v235_v26  ;;  %v266_v36 = vrot.slane (!%p138_p2), %v179_v28, %v265_v27  ;;  %v240_v38 = vrot.slane (!%p138_p2), %v179_v28, %v239_v29 }
   0xc   : > { %v270_v39 = vrot.slane (!%p138_p2), %v179_v28, %v269_v31 }
   0xd   : > { %s489_s13 = smov (!%p161_p3, %s364_s13), 1  ;;  %v246_v43 = vrot.slane %v236_v35, %v235_v26  ;;  %v276_v45 = vrot.slane %v266_v36, %v265_v27  ;;  %v250_v46 = vrot.slane %v240_v38, %v235_v26 }
   0xe   : > { %s375_s18 = sshll.u32 %s489_s13, 5  ;;  %v280_v48 = vrot.slane %v270_v39, %v265_v27 }
   0xf   : > { %393 = vset.pattern.permute.xlu1 %v424_v4  ;;  %392 = vset.pattern.permute.xlu0 %v424_v4  ;;  %s165_s21 = scalar_lea.vmem %s486_s2, %s375_s18  ;;  %s170_s26 = scalar_lea.vmem %s487_s3, %s375_s18 }
  0x10   : > { %260 = vperm.xlu1 %393, %v176_v3   ;;  %256 = vperm.xlu0 %392, %v175_v0   ;;  %v171_v9 = vld [vmem:[%s165_s21] sm:$0xff]  ;;  %v172_v10 = vld [vmem:[%s165_s21 + $0x8] sm:$0xff]  ;;  %v173_v14 = vld [vmem:[%s165_s21 + $0x10] sm:$0x7f] }
  0x11   : > { %v174_v15 = vld [vmem:[%s165_s21 + $0x18] sm:$0x7f] }
  0x14   : > { %394 = vset.pattern.permute.xlu1 %v426_v8  ;;  %395 = vset.pattern.permute.xlu0 %v426_v8 }
  0x15   : > { %213 = vperm.xlu1 %394, %v210_v6   ;;  %216 = vperm.xlu0 %395, %v211_v7  }
  0x19   : > { %396 = vset.pattern.permute.xlu1 %v425_v5  ;;  %397 = vset.pattern.permute.xlu0 %v425_v5 }
  0x1a   : > { %294 = vperm.xlu1 %396, %v175_v0  }
  0x1e   : > { %298 = vperm.xlu1 %396, %v176_v3  }
  0x86   : > { %v183_v11 = vpop.permute.xlu0 %182  ;;  %v226_v22 = vpop.permute.xlu1 %225 }
  0x87   : > { %v190_v12 = vmul.f32 %v183_v11, %v171_v9  ;;  %v191_v13 = vmul.f32 %v183_v11, %v172_v10  ;;  %v251_v51 = vmul.f32 %v246_v43, %v226_v22  ;;  %v252_v53 = vmul.f32 %v250_v46, %v226_v22 }
  0x89   : > { %v194_v16 = vmul.f32 1.442695, %v190_v12  ;;  %v196_v17 = vmul.f32 1.442695, %v191_v13 }
  0x8a   : > { %v188_v19 = vpop.permute.xlu0 %187  ;;  %v230_v30 = vpop.permute.xlu1 %229 }
  0x8b   : > { %398 = vpow2.f32 %v194_v16  ;;  %v192_v20 = vmul.f32 %v188_v19, %v173_v14  ;;  %v193_v21 = vmul.f32 %v188_v19, %v174_v15  ;;  %v253_v57 = vmul.f32 %v246_v43, %v230_v30 }
  0x8c   : > { %400 = vpow2.f32 %v196_v17  ;;  %v254_v61 = vmul.f32 %v250_v46, %v230_v30 }
  0x8d   : > { %v198_v23 = vmul.f32 1.442695, %v192_v20  ;;  %v200_v24 = vmul.f32 1.442695, %v193_v21 }
  0x8f   : > { %402 = vpow2.f32 %v198_v23  ;;  %v261_v41 = vpop.permute.xlu1 %260  ;;  %v257_v49 = vpop.permute.xlu0 %256 }
  0x90   : > { %404 = vpow2.f32 %v200_v24  ;;  %v281_v52 = vmul.f32 %v276_v45, %v257_v49  ;;  %v282_v54 = vmul.f32 %v280_v48, %v257_v49  ;;  %v283_v58 = vmul.f32 %v276_v45, %v261_v41 }
  0x91   : > { %v284_v62 = vmul.f32 %v280_v48, %v261_v41 }
  0x92   : > { %v285_v59 = vadd.f32 %v281_v52, %v251_v51  ;;  %v286_v63 = vadd.f32 %v282_v54, %v252_v53  ;;  %v287_v6 = vadd.f32 %v283_v58, %v253_v57 }
  0x93   : > { %v288_v9 = vadd.f32 %v284_v62, %v254_v61 }
  0x94   : > { %v214_v50 = vpop.permute.xlu1 %213  ;;  %v217_v55 = vpop.permute.xlu0 %216 }
  0x95   : > { %v399_v32 = vpop.eup %398  ;;  %vm218_vm2 = vcmp.eq.s32.totalorder %v214_v50, 1  ;;  %vm219_vm3 = vcmp.eq.s32.totalorder %v217_v55, 1 }
  0x96   : > { %v401_v33 = vpop.eup %400  ;;  %v202_v34 = vadd.f32 1.0, %v399_v32 }
  0x97   : > { %v203_v37 = vadd.f32 1.0, %v401_v33 }
  0x98   : > { %406 = vrcp.f32 %v202_v34 }
  0x99   : > { %v403_v40 = vpop.eup %402  ;;  %408 = vrcp.f32 %v203_v37  ;;  %v295_v1 = vpop.permute.xlu1 %294 }
  0x9a   : > { %v405_v42 = vpop.eup %404  ;;  %v204_v44 = vadd.f32 1.0, %v403_v40 }
  0x9b   : > { %v205_v47 = vadd.f32 1.0, %v405_v42 }
  0x9c   : > { %410 = vrcp.f32 %v204_v44 }
  0x9d   : > { %412 = vrcp.f32 %v205_v47  ;;  %v299_v14 = vpop.permute.xlu1 %298 }
  0xa2   : > { %v407_v56 = vpop.eup %406 }
  0xa3   : > { %v409_v60 = vpop.eup %408  ;;  %v220_v0 = vsel %vm218_vm2, %v407_v56, %v399_v32 }
  0xa4   : > { %v221_v2 = vsel %vm218_vm2, %v409_v60, %v401_v33  ;;  %v289_v3 = vadd.f32 %v285_v59, %v220_v0 }
  0xa5   : > { %v290_v4 = vadd.f32 %v286_v63, %v221_v2 }
  0xa6   : > { %v411_v5 = vpop.eup %410  ;;  %v301_v7 = vmul.f32 %v295_v1, %v289_v3 }
  0xa7   : > { %v413_v8 = vpop.eup %412  ;;  %v302_v10 = vmul.f32 %v295_v1, %v290_v4  ;;  %v222_v11 = vsel %vm219_vm3, %v411_v5, %v403_v40 }
  0xa8   : > { %305 = vst [vmem:[%s170_s26] sm:$0xff] %v301_v7  ;;  %v223_v12 = vsel %vm219_vm3, %v413_v8, %v405_v42  ;;  %v291_v13 = vadd.f32 %v287_v6, %v222_v11 }
  0xa9   : > { %306 = vst [vmem:[%s170_s26 + $0x8] sm:$0xff] %v302_v10  ;;  %v292_v15 = vadd.f32 %v288_v9, %v223_v12 }
  0xaa   : > { %v303_v16 = vmul.f32 %v299_v14, %v291_v13 }
  0xab   : > { %v304_v17 = vmul.f32 %v299_v14, %v292_v15 }
  0xac   : > { %307 = vst [vmem:[%s170_s26 + $0x10] sm:$0x7f] %v303_v16 }
  0xad   : > { %308 = vst [vmem:[%s170_s26 + $0x18] sm:$0x7f] %v304_v17 }
  0xae PF: > { %s13_s12 = sadd.s32 1, %s420_s12  }
  0xaf   : > { %p10_p4 = scmp.ge.s32.totalorder %s13_s12, 4  }
  0xb1   :  { %12 = sbr.rel (!%p10_p4) target bundleno = 1 (0x1), region = 62 }

</bundles_post_ra>
